<compile_context>
chip_gen: v5e
topology: v5e:2x2
jax: 0.10.0
libtpu: 0.0.40
codegen_flags: <defaults>
</compile_context>

<pallas_src>
import functools

import jax
import jax.numpy as jnp
from jax.experimental import pallas as pl
from jax.experimental.pallas import tpu as pltpu


def _round_up(x, m):
    return ((x + m - 1) // m) * m


def _dwconv_kernel(x_ref, h_ref, w_ref, b_ref, o_ref, *, kernel_size, out_tile):
    # x_ref: (Rt, Lt)  current input window (padded-L coordinates)
    # h_ref: (Rt, H)   lookahead halo: the next H elements along L
    # w_ref: (Rt, K)   per-row (per (batch, channel)) filter taps
    # b_ref: (Rt, 1)   per-row bias
    # o_ref: (Rt, Lt)
    # Single f32 cast of the (Rt, Lt+H) window; taps are lane-shifted slices.
    xw = jnp.concatenate([x_ref[...], h_ref[...]], axis=-1).astype(jnp.float32)
    w = w_ref[...].astype(jnp.float32)
    # Fold the bias into the accumulator init (saves one add pass over the tile).
    acc = jnp.broadcast_to(b_ref[...].astype(jnp.float32), o_ref.shape)
    for k in range(kernel_size):                               # K small & static
        acc = acc + xw[:, k:k + out_tile] * w[:, k:k + 1]
    o_ref[...] = acc.astype(o_ref.dtype)


def depthwise_conv1d(x, weight, bias, padding, *, lt_target=1024, rt_target=256):
    """x: (B, C, L); weight: (C, 1, K); bias: (C,); padding: (left, right)."""
    B, C, L = x.shape
    K = weight.shape[-1]
    pad_l, pad_r = padding
    Lout = L + pad_l + pad_r - K + 1
    assert Lout >= 1, "invalid padding / kernel_size combination"

    # ---- tile sizes --------------------------------------------------------
    R = B * C                                 # flattened (batch, channel) rows
    Rpad = _round_up(R, 8)                    # dense sublanes
    # Halo width: smallest multiple of 128 covering the K-1 lookahead taps.
    H = max(128, _round_up(K - 1, 128))
    # Output L tile: multiple of H (so the halo block index is exact) and of
    # 128 (lane-dense stores), capped for VMEM.
    Lt = min(_round_up(lt_target, H), _round_up(Lout, H))
    nLt = pl.cdiv(Lout, Lt)
    Lout_pad = nLt * Lt
    Lin = Lout_pad + H                        # covers every tile's Lt + H window
    # Row (sublane) tile: largest candidate multiple of 8 dividing Rpad.
    Rt = 8
    for cand in (rt_target, 128, 64, 32, 16, 8):
        if cand <= Rpad and Rpad % cand == 0:
            Rt = cand
            break
    nRt = Rpad // Rt

    # Flatten (B, C) -> rows; single zero-pad along rows / L — no transposes.
    x_in = jnp.pad(x.reshape(R, L), ((0, Rpad - R), (pad_l, Lin - L - pad_l)))
    w_rk = jnp.pad(jnp.tile(weight[:, 0, :], (B, 1)), ((0, Rpad - R), (0, 0)))
    b_r1 = jnp.pad(jnp.tile(bias.reshape(C, 1), (B, 1)), ((0, Rpad - R), (0, 0)))

    kernel = functools.partial(_dwconv_kernel, kernel_size=K, out_tile=Lt)
    lt_over_h = Lt // H                       # halo block-index stride

    out = pl.pallas_call(
        kernel,
        out_shape=jax.ShapeDtypeStruct((Rpad, Lout_pad), x.dtype),
        grid_spec=pltpu.PrefetchScalarGridSpec(
            num_scalar_prefetch=0,
            grid=(nRt, nLt),
            in_specs=[
                # current (Rt, Lt) window
                pl.BlockSpec((Rt, Lt), lambda ri, li: (ri, li)),
                # lookahead halo: next H elements along L (same array)
                pl.BlockSpec((Rt, H),
                             lambda ri, li: (ri, (li + 1) * lt_over_h)),
                # per-row taps / bias (constant across the inner L sweep)
                pl.BlockSpec((Rt, K), lambda ri, li: (ri, 0)),
                pl.BlockSpec((Rt, 1), lambda ri, li: (ri, 0)),
            ],
            out_specs=pl.BlockSpec((Rt, Lt), lambda ri, li: (ri, li)),
        ),
        compiler_params=pltpu.CompilerParams(
            dimension_semantics=("parallel", "parallel"),
            # Blocks are ~1 MiB; ~6 MiB live with double buffering. 32 MiB is
            # safe on v5e/v6e (128 MiB physical) and v7x (64 MiB physical).
            vmem_limit_bytes=32 * 1024 * 1024,
        ),
    )(x_in, x_in, w_rk, b_r1)

    if Rpad != R or Lout_pad != Lout:
        out = out[:R, :Lout]
    return out.reshape(B, C, Lout)


def _reference(x, weight, bias, padding):
    K = weight.shape[-1]
    xp = jnp.pad(x, ((0, 0), (0, 0), (padding[0], padding[1])))
    Lout = xp.shape[-1] - K + 1
    out = sum(xp[:, :, k:k + Lout] * weight[:, 0, k][None, :, None]
              for k in range(K))
    return out + bias[None, :, None]


if __name__ == "__main__":
    # --- small config matching the module's toy usage (causal pad = K-1) ----
    B, C, L, K = 2, 4, 16, 4
    padding = (K - 1, 0)
    bound = 1.0 / (K ** 0.5)

    kx, kw, kb = jax.random.split(jax.random.PRNGKey(0), 3)
    x = jax.random.normal(kx, (B, C, L), dtype=jnp.float32)
    weight = jax.random.uniform(kw, (C, 1, K), minval=-bound, maxval=bound,
                                dtype=jnp.float32)
    bias = jax.random.uniform(kb, (C,), minval=-bound, maxval=bound,
                              dtype=jnp.float32)

    out = depthwise_conv1d(x, weight, bias, padding)
    jax.block_until_ready(out)
    ref = _reference(x, weight, bias, padding)
    assert out.shape == (B, C, L + padding[0] + padding[1] - K + 1)
    assert jnp.allclose(out, ref, atol=1e-5, rtol=1e-5)

    # --- TPU-shaped config exercising the (row-tile, L-tile) grid path ------
    B2, C2, L2, K2 = 1, 256, 2048, 4
    padding2 = (K2 - 1, 0)
    kx2, kw2, kb2 = jax.random.split(jax.random.PRNGKey(1), 3)
    x2 = jax.random.normal(kx2, (B2, C2, L2), dtype=jnp.float32)
    w2 = jax.random.uniform(kw2, (C2, 1, K2), minval=-bound, maxval=bound,
                            dtype=jnp.float32)
    b2 = jax.random.uniform(kb2, (C2,), minval=-bound, maxval=bound,
                            dtype=jnp.float32)
    out2 = depthwise_conv1d(x2, w2, b2, padding2)
    jax.block_until_ready(out2)
    ref2 = _reference(x2, w2, b2, padding2)
    assert out2.shape == ref2.shape
    assert jnp.allclose(out2, ref2, atol=1e-4, rtol=1e-4)

    print("KERNEL_OK")
</pallas_src>

<mosaic_0001>
module attributes {stable_mosaic.version = 11 : i64} {
  func.func @_dwconv_kernel(%arg0: i32, %arg1: i32, %arg2: memref<8x128xf32, #tpu.memory_space<vmem>>, %arg3: memref<8x128xf32, #tpu.memory_space<vmem>>, %arg4: memref<8x4xf32, #tpu.memory_space<vmem>>, %arg5: memref<8x1xf32, #tpu.memory_space<vmem>>, %arg6: memref<8x128xf32, #tpu.memory_space<vmem>>) attributes {dimension_semantics = [#tpu.dimension_semantics<parallel>, #tpu.dimension_semantics<parallel>], iteration_bounds = array<i64: 1, 1>, scalar_prefetch = 0 : i64, scratch_operands = 0 : i64, tpu.core_type = #tpu.core_type<tc>, window_params = [{transform_indices = @transform_0, window_bounds = array<i64: 8, 128>}, {transform_indices = @transform_1, window_bounds = array<i64: 8, 128>}, {transform_indices = @transform_2, window_bounds = array<i64: 8, 4>}, {transform_indices = @transform_3, window_bounds = array<i64: 8, 1>}, {transform_indices = @transform_4, window_bounds = array<i64: 8, 128>}]} {
    %c0 = arith.constant 0 : index
    %c0_0 = arith.constant 0 : index
    %0 = vector.load %arg2[%c0, %c0_0] : memref<8x128xf32, #tpu.memory_space<vmem>>, vector<8x128xf32>
    %c0_1 = arith.constant 0 : index
    %c0_2 = arith.constant 0 : index
    %1 = vector.load %arg3[%c0_1, %c0_2] : memref<8x128xf32, #tpu.memory_space<vmem>>, vector<8x128xf32>
    %2 = tpu.concatenate %0, %1 in 1 : vector<8x128xf32>, vector<8x128xf32> -> vector<8x256xf32>
    %c0_3 = arith.constant 0 : index
    %c0_4 = arith.constant 0 : index
    %3 = vector.load %arg4[%c0_3, %c0_4] : memref<8x4xf32, #tpu.memory_space<vmem>>, vector<8x4xf32>
    %c0_5 = arith.constant 0 : index
    %c0_6 = arith.constant 0 : index
    %4 = vector.load %arg5[%c0_5, %c0_6] : memref<8x1xf32, #tpu.memory_space<vmem>>, vector<8x1xf32>
    %5 = vector.shape_cast %4 : vector<8x1xf32> to vector<8x1xf32>
    %6 = vector.broadcast %5 : vector<8x1xf32> to vector<8x128xf32>
    %7 = vector.extract_strided_slice %2 {offsets = [0, 0], sizes = [8, 128], strides = [1, 1]} : vector<8x256xf32> to vector<8x128xf32>
    %8 = vector.extract_strided_slice %3 {offsets = [0, 0], sizes = [8, 1], strides = [1, 1]} : vector<8x4xf32> to vector<8x1xf32>
    %9 = vector.broadcast %8 : vector<8x1xf32> to vector<8x128xf32>
    %10 = arith.mulf %7, %9 : vector<8x128xf32>
    %11 = arith.addf %6, %10 : vector<8x128xf32>
    %12 = vector.extract_strided_slice %2 {offsets = [0, 1], sizes = [8, 128], strides = [1, 1]} : vector<8x256xf32> to vector<8x128xf32>
    %13 = vector.extract_strided_slice %3 {offsets = [0, 1], sizes = [8, 1], strides = [1, 1]} : vector<8x4xf32> to vector<8x1xf32>
    %14 = vector.broadcast %13 : vector<8x1xf32> to vector<8x128xf32>
    %15 = arith.mulf %12, %14 : vector<8x128xf32>
    %16 = arith.addf %11, %15 : vector<8x128xf32>
    %17 = vector.extract_strided_slice %2 {offsets = [0, 2], sizes = [8, 128], strides = [1, 1]} : vector<8x256xf32> to vector<8x128xf32>
    %18 = vector.extract_strided_slice %3 {offsets = [0, 2], sizes = [8, 1], strides = [1, 1]} : vector<8x4xf32> to vector<8x1xf32>
    %19 = vector.broadcast %18 : vector<8x1xf32> to vector<8x128xf32>
    %20 = arith.mulf %17, %19 : vector<8x128xf32>
    %21 = arith.addf %16, %20 : vector<8x128xf32>
    %22 = vector.extract_strided_slice %2 {offsets = [0, 3], sizes = [8, 128], strides = [1, 1]} : vector<8x256xf32> to vector<8x128xf32>
    %23 = vector.extract_strided_slice %3 {offsets = [0, 3], sizes = [8, 1], strides = [1, 1]} : vector<8x4xf32> to vector<8x1xf32>
    %24 = vector.broadcast %23 : vector<8x1xf32> to vector<8x128xf32>
    %25 = arith.mulf %22, %24 : vector<8x128xf32>
    %26 = arith.addf %21, %25 : vector<8x128xf32>
    %c0_7 = arith.constant 0 : index
    %c0_8 = arith.constant 0 : index
    %27 = vector.load %arg6[%c0_7, %c0_8] : memref<8x128xf32, #tpu.memory_space<vmem>>, vector<8x128xf32>
    tpu.vector_store %arg6[%c0_7, %c0_8], %26 {strides = array<i32>} : memref<8x128xf32, #tpu.memory_space<vmem>>, vector<8x128xf32>,
    return
  }
  func.func @transform_0(%arg0: i32, %arg1: i32) -> (i32, i32) {
    %c0_i32 = arith.constant 0 : i32
    return %arg0, %arg1 : i32, i32
  }
  func.func @transform_1(%arg0: i32, %arg1: i32) -> (i32, i32) {
    %c1_i32 = arith.constant 1 : i32
    %0 = arith.addi %arg1, %c1_i32 : i32
    %c1_i32_0 = arith.constant 1 : i32
    %1 = arith.muli %0, %c1_i32_0 : i32
    %c0_i32 = arith.constant 0 : i32
    return %arg0, %1 : i32, i32
  }
  func.func @transform_2(%arg0: i32, %arg1: i32) -> (i32, i32) {
    %c0_i32 = arith.constant 0 : i32
    %c0_i32_0 = arith.constant 0 : i32
    return %arg0, %c0_i32 : i32, i32
  }
  func.func @transform_3(%arg0: i32, %arg1: i32) -> (i32, i32) {
    %c0_i32 = arith.constant 0 : i32
    %c0_i32_0 = arith.constant 0 : i32
    return %arg0, %c0_i32 : i32, i32
  }
  func.func @transform_4(%arg0: i32, %arg1: i32) -> (i32, i32) {
    %c0_i32 = arith.constant 0 : i32
    return %arg0, %arg1 : i32, i32
  }
}

</mosaic_0001>

<bundles_post_ra>
// kernel: tpu_custom_call.1
= control target key start
LH: loop header
LB: loop body
LE: loop exit
PB: predicated region body
PF: predicated region fallthrough
CT: control target
= control target key end

     0   :  { %9 = vsyncpa [#allocation3], 0  ;;  %s235_s0 = inlined_call_operand.vmem [shape: f32[8,256], index: 0, kind: input, shape index: {}]   ;;  %s236_s1 = inlined_call_operand.hbm [shape: f32[8,256], index: 1, kind: input, shape index: {}]   ;;  %s237_s2 = inlined_call_operand.vmem [shape: f32[8,4], index: 2, kind: input, shape index: {}]   ;;  %s238_s3 = inlined_call_operand.vmem [shape: f32[8,1], index: 3, kind: input, shape index: {}]   ;;  %s239_s4 = inlined_call_operand.hbm [shape: f32[8,128], index: 4, kind: output, shape index: {}]  }
   0x1   :  { %10 = vsyncpa [#allocation4], 0  ;;  %s118_s17 = scalar_lea.hbm %s236_s1, 8  ;;  %s186_s19 = smov [#allocation2]  }
   0x2   :  { %s21_s18 = sshll.u32 %s118_s17, 4  ;;  %s23_s20 = sshll.u32 %s186_s19, 4  ;;  %s22_s18 = int_to_ptr.hbm [resolvable:$true] %s21_s18  ;;  %s24_s20 = int_to_ptr.vmem [resolvable:$true] %s23_s20 }
   0x3   :  { %26 = dma.hbm_to_vmem [thread:$0]  %s22_s18, 128, %s24_s20, [#allocation3]  }
   0x4   :  { %182 = dma.done.wait [#allocation3], 128  }
   0x5   :  { %183 = vsyncadd [#allocation3], 4294967168  ;;  %v187_v0 = vmov 1   ;;  %v188_v1 = vmov 3   ;;  %v189_v2 = vmov 0   ;;  %v38_v3 = vld [vmem:[%s237_s2] sm:$0xff] }
   0x6   :  { %128 = vset.pattern.permute.xlu0 %v187_v0  ;;  %130 = vset.pattern.permute.xlu1 %v188_v1  ;;  %v39_v4 = vld [vmem:[%s238_s3] sm:$0xff]  ;;  %v190_v5 = vmov 2   ;;  %s191_s2 = smov 127   ;;  %s192_s3 = smov 125   ;;  %vm64_vm0 = vcmask 1039360   ;;  %vm80_vm1 = vcmask 1031168  }
   0x7   :  { %132 = vset.pattern.permute.xlu2 %v189_v2  ;;  %53 = vperm.xlu0 %128, %v38_v3   ;;  %v36_v6 = vld [vmem:[%s235_s0] sm:$0xff]  ;;  %s193_s26 = smov 126   ;;  %vm96_vm2 = vcmask 1022976   ;;  %s194_s0 = smov [#allocation5]  }
   0x8   :  { %85 = vperm.xlu1 %130, %v38_v3   ;;  %42 = vperm.xlu2 %132, %v39_v4   ;;  %v37_v7 = vld [vmem:[#allocation2] sm:$0xff]  ;;  %s106_s27 = sshll.u32 %s194_s0, 4  ;;  %s108_s30 = sshll.u32 %s239_s4, 4  ;;  %s107_s27 = int_to_ptr.vmem [resolvable:$true] %s106_s27  ;;  %s109_s30 = int_to_ptr.hbm [resolvable:$true] %s108_s30 }
   0xf   :  { %129 = vset.pattern.permute.xlu0 %v190_v5 }
  0x10   :  { %131 = vset.pattern.permute.xlu1 %v189_v2  ;;  %69 = vperm.xlu0 %129, %v38_v3  }
  0x11   :  { %47 = vperm.xlu1 %131, %v38_v3  }
  0x18   :  { %133 = vset.pattern.permute.xlu0 %v188_v1 }
  0x62   :  { %v43_v17 = vpop.permute.xlu2 %42 }
  0x79   :  { %v54_v8 = vpop.permute.xlu0 %53 }
  0x7a   :  { %v56_v9 = vmul.f32 %v54_v8, %v36_v6  ;;  %v57_v10 = vmul.f32 %v54_v8, %v37_v7  ;;  %v86_v11 = vpop.permute.xlu1 %85 }
  0x7b   :  { %v88_v12 = vmul.f32 %v86_v11, %v36_v6  ;;  %v89_v16 = vmul.f32 %v86_v11, %v37_v7 }
  0x7c   :  { %62 = vrot.lane.b32.xlu1 %v57_v10, %s191_s2  ;;  %60 = vrot.lane.b32.xlu2 %v56_v9, %s191_s2 }
  0x82   :  { %v70_v13 = vpop.permute.xlu0 %69 }
  0x83   :  { %v72_v14 = vmul.f32 %v70_v13, %v36_v6  ;;  %v73_v15 = vmul.f32 %v70_v13, %v37_v7  ;;  %v48_v19 = vpop.permute.xlu1 %47 }
  0x84   :  { %92 = vrot.lane.b32.xlu1 %v88_v12, %s192_s3  ;;  %v50_v22 = vmul.f32 %v48_v19, %v36_v6 }
  0x85   :  { %78 = vrot.lane.b32.xlu0 %v73_v15, %s193_s26  ;;  %76 = vrot.lane.b32.xlu2 %v72_v14, %s193_s26 }
  0x86   :  { %v51_v24 = vadd.f32 %v50_v22, %v43_v17 }
  0x8d   :  { %94 = vrot.lane.b32.xlu2 %v89_v16, %s192_s3 }
  0xd6   :  { %v61_v18 = vpop.permute.xlu2 %60 }
  0xdf   :  { %v77_v21 = vpop.permute.xlu2 %76 }
  0xe7   :  { %v95_v29 = vpop.permute.xlu2 %94 }
  0xee   :  { %v63_v20 = vpop.permute.xlu1 %62 }
  0xef   :  { %v65_v23 = vsel %vm64_vm0, %v61_v18, %v63_v20 }
  0xf0   :  { %v67_v25 = vadd.f32 %v65_v23, %v51_v24 }
  0xf6   :  { %v93_v26 = vpop.permute.xlu1 %92 }
  0xf7   :  { %v79_v27 = vpop.permute.xlu0 %78  ;;  %v97_v31 = vsel %vm96_vm2, %v93_v26, %v95_v29 }
  0xf8   :  { %v81_v28 = vsel %vm80_vm1, %v77_v21, %v79_v27 }
  0xf9   :  { %v83_v30 = vadd.f32 %v81_v28, %v67_v25 }
  0xfb   :  { %v99_v32 = vadd.f32 %v97_v31, %v83_v30 }
  0xfd   :  { %100 = vst [vmem:[#allocation5] sm:$0xff] %v99_v32 }
  0xfe   :  { %111 = dma.vmem_to_hbm [thread:$0]  %s107_s27, 128, %s109_s30, [#allocation4]  }
  0xff   :  { %184 = dma.done.wait [#allocation4], 128  }
 0x100   :  { %185 = vsyncadd [#allocation4], 4294967168 }
 0x101   :  { %116 = vsyncpa [#allocation3], 1 }
 0x102   :  { %117 = vsyncpa [#allocation4], 1 }

</bundles_post_ra>
